<compile_context>
chip_gen: v7x
topology: tpu7x:2x2x1
jax: 0.10.0
libtpu: 0.0.40
codegen_flags: <defaults>
</compile_context>

<pallas_src>
import functools

import jax
import jax.numpy as jnp
from jax.experimental import pallas as pl
from jax.experimental.pallas import tpu as pltpu


def _temporal_gc_kernel(x_ref, m_ref, b_ref, o_ref, *,
                        Kh, t_dilation, t_stride, T_out, Nb):
    # x_ref : (Nb, T_pad, C_in*V)    bf16  time on sublanes, (chan,node) on lanes
    # m_ref : (Kh*C_in*V, tile_cw)   bf16  conv weight with A pre-contracted in
    # b_ref : (1, tile_cw)           f32   bias folded through the graph conv
    # o_ref : (Nb, T_out, tile_cw)         lane-dense output slab
    m = m_ref[...]
    bias = b_ref[...]
    for b in range(Nb):                       # static, small (<= 8)
        cols = []
        for dk in range(Kh):                  # im2col: concat shifted windows on lanes
            start = dk * t_dilation           # static offsets
            if t_stride == 1:
                cols.append(x_ref[b, pl.ds(start, T_out), :])
            else:
                cols.append(x_ref[b, pl.ds(start, T_out, stride=t_stride), :])
        lhs = cols[0] if Kh == 1 else jnp.concatenate(cols, axis=-1)
        acc = jnp.dot(lhs, m, preferred_element_type=jnp.float32)
        o_ref[b] = (acc + bias).astype(o_ref.dtype)   # single bias-add/cast pass


def temporal_gc(x, A, weight, bias, *, kernel_size,
                t_kernel_size=1, t_stride=1, t_padding=0, t_dilation=1,
                compute_dtype=jnp.bfloat16, out_dtype=None):
    """Pallas implementation of TemporalGC.forward(x, A)."""
    N, C_in, T, V = x.shape
    K = kernel_size
    assert A.shape[0] == K
    # The einsum requires the V axis to survive the conv, i.e. t_kernel_size == 1
    # (the module's default).
    assert t_kernel_size == 1
    KC, _, Kh, _ = weight.shape
    C_out = KC // K

    out_dtype = jnp.dtype(x.dtype if out_dtype is None else out_dtype)
    cdt = jnp.dtype(compute_dtype)

    T_pad = T + 2 * t_padding
    T_conv = T_pad - t_dilation * (Kh - 1)           # stride-1 conv length
    T_out = (T_conv - 1) // t_stride + 1             # emitted directly by the kernel
    CIV = C_in * V
    CW = C_out * V

    # ---- wrapper-side layout: cast + (optional) pad + transpose/reshape ----
    # TODO(synk): fold the temporal zero-padding into the kernel with masked edge
    # windows to save the extra HBM round-trip of x when t_padding > 0.
    xc = x.astype(cdt)
    if t_padding:
        xc = jnp.pad(xc, ((0, 0), (0, 0), (t_padding, t_padding), (0, 0)))
    x_t = jnp.transpose(xc, (0, 2, 1, 3)).reshape(N, T_pad, CIV)

    # ---- fold adjacency + bias into the conv weight (f32, parameter-sized) ----
    #   M2[dk*CIV + ci*V + v, c*V + w] = sum_k W[k*C_out+c, ci, dk] * A[k, v, w]
    Wr = weight[:, :, :, 0].reshape(K, C_out, C_in, Kh).astype(jnp.float32)
    M = jnp.einsum('kcid,kvw->divcw', Wr, A.astype(jnp.float32))
    M2 = M.reshape(Kh * CIV, CW).astype(cdt)   # keep f32 here if accuracy regresses
    #   b_gc[c, w] = sum_k bias[k*C_out+c] * sum_v A[k, v, w]
    b_gc = jnp.einsum('kc,kw->cw',
                      bias.reshape(K, C_out).astype(jnp.float32),
                      jnp.sum(A.astype(jnp.float32), axis=1)).reshape(1, CW)

    # ---- tiling ----
    # Bound the weight block (~<= 8 MiB) with a lane-dense C_out*V tile.
    if Kh * CIV * CW * cdt.itemsize <= 8 * 2 ** 20:
        tile_cw = CW                                  # full width (always legal)
    else:
        tile_cw = next((c for c in (1024, 896, 768, 640, 512, 384, 256, 128)
                        if CW % c == 0), 512)         # fallback: edge block masked
    num_cw = -(-CW // tile_cw)

    # Batch Nb samples per grid step so each step emits >= ~512 output rows.
    Nb = min(N, 8, max(1, -(-512 // max(T_out, 1))))
    while N % Nb:
        Nb -= 1
    num_nb = N // Nb

    kernel = functools.partial(_temporal_gc_kernel, Kh=Kh, t_dilation=t_dilation,
                               t_stride=t_stride, T_out=T_out, Nb=Nb)

    # VMEM budget: double-buffered x / M / bias / out blocks + in-kernel temporaries.
    blk_bytes = 2 * (Nb * T_pad * CIV * cdt.itemsize
                     + Kh * CIV * tile_cw * cdt.itemsize
                     + tile_cw * 4
                     + Nb * T_out * tile_cw * out_dtype.itemsize)
    tmp_bytes = T_out * (Kh * CIV * cdt.itemsize + tile_cw * 4)
    vmem_limit = int(min(max(blk_bytes + 2 * tmp_bytes, 32 * 2 ** 20), 64 * 2 ** 20))

    cost = pl.CostEstimate(
        flops=2 * N * T_out * Kh * CIV * CW,
        transcendentals=0,
        bytes_accessed=int(N * T_pad * CIV * cdt.itemsize
                           + Kh * CIV * CW * cdt.itemsize + CW * 4
                           + N * T_out * CW * out_dtype.itemsize))

    # TODO(synk): single-buffer the grid-invariant M2 / b_gc blocks via
    # pipeline_mode=pl.Buffered(1) to halve their VMEM share; the capacity concern
    # is already bounded here by the C_out*V tiling + vmem_limit sizing.
    out = pl.pallas_call(
        kernel,
        out_shape=jax.ShapeDtypeStruct((N, T_out, CW), out_dtype),
        grid=(num_cw, num_nb),                        # cw outer: the big weight block
        in_specs=[                                    # is refetched only num_cw times
            pl.BlockSpec((Nb, T_pad, CIV), lambda j, i: (i, 0, 0)),
            pl.BlockSpec((Kh * CIV, tile_cw), lambda j, i: (0, j)),
            pl.BlockSpec((1, tile_cw), lambda j, i: (0, j)),
        ],
        out_specs=pl.BlockSpec((Nb, T_out, tile_cw), lambda j, i: (i, 0, j)),
        compiler_params=pltpu.CompilerParams(
            dimension_semantics=("parallel", "parallel"),
            vmem_limit_bytes=vmem_limit),
        cost_estimate=cost,
    )(x_t, M2, b_gc)

    # (N, T_out, C_out*V) -> (N, C_out, T_out, V); stride already applied in-kernel.
    out = out.reshape(N, T_out, C_out, V).transpose(0, 2, 1, 3)
    return out, A


def _reference(x, A, weight, bias, *, kernel_size,
               t_stride=1, t_padding=0, t_dilation=1):
    """Pure-JAX (f32) reference mirroring the PyTorch forward."""
    K = kernel_size
    y = jax.lax.conv_general_dilated(
        x, weight,
        window_strides=(t_stride, 1),
        padding=((t_padding, t_padding), (0, 0)),
        rhs_dilation=(t_dilation, 1),
        dimension_numbers=("NCHW", "OIHW", "NCHW"))
    y = y + bias[None, :, None, None]
    n, kc, t, v = y.shape
    y = y.reshape(n, K, kc // K, t, v)
    out = jnp.einsum("nkctv,kvw->nctw", y, A)
    return out, A


if __name__ == "__main__":
    # Small deterministic test shapes consistent with the module:
    #   N=2, C_in=4, C_out=8, K (graph kernel) = 3, T=16, V=16
    N, C_in, C_out, K, T, V = 2, 4, 8, 3, 16, 16

    key = jax.random.PRNGKey(0)
    k1, k2, k3, k4 = jax.random.split(key, 4)

    x = jax.random.normal(k1, (N, C_in, T, V), jnp.float32)
    A = jax.random.normal(k2, (K, V, V), jnp.float32)

    # Deterministic parameter init (Conv2d-like uniform bounds).
    fan_in = C_in * K * 1
    bound = 1.0 / (fan_in ** 0.5)
    weight = jax.random.uniform(k3, (K * C_out, C_in, K, 1), jnp.float32,
                                minval=-bound, maxval=bound)
    bias = jax.random.uniform(k4, (K * C_out,), jnp.float32,
                              minval=-bound, maxval=bound)

    fwd = jax.jit(functools.partial(temporal_gc, kernel_size=K))
    out, A_out = fwd(x, A, weight, bias)
    out = jax.block_until_ready(out)

    ref, _ = _reference(x, A, weight, bias, kernel_size=K)
    assert out.shape == (N, C_out, T - K + 1, V), out.shape
    # bf16 matmul operands with f32 accumulation -> loosened tolerance.
    err = float(jnp.max(jnp.abs(out - ref)))
    scale = float(jnp.max(jnp.abs(ref)))
    assert err <= 5e-2 * scale + 1e-5, (err, scale)

    print("KERNEL_OK")
</pallas_src>

<mosaic_0001>
module attributes {stable_mosaic.version = 11 : i64} {
  func.func @_temporal_gc_kernel(%arg0: i32, %arg1: i32, %arg2: memref<2x16x64xbf16, #tpu.memory_space<vmem>>, %arg3: memref<192x128xbf16, #tpu.memory_space<vmem>>, %arg4: memref<1x128xf32, #tpu.memory_space<vmem>>, %arg5: memref<2x14x128xf32, #tpu.memory_space<vmem>>) attributes {dimension_semantics = [#tpu.dimension_semantics<parallel>, #tpu.dimension_semantics<parallel>], iteration_bounds = array<i64: 1, 1>, scalar_prefetch = 0 : i64, scratch_operands = 0 : i64, tpu.core_type = #tpu.core_type<tc>, window_params = [{transform_indices = @transform_0, window_bounds = array<i64: 2, 16, 64>}, {transform_indices = @transform_1, window_bounds = array<i64: 192, 128>}, {transform_indices = @transform_2, window_bounds = array<i64: 1, 128>}, {transform_indices = @transform_3, window_bounds = array<i64: 2, 14, 128>}]} {
    %c0 = arith.constant 0 : index
    %c0_0 = arith.constant 0 : index
    %0 = vector.load %arg3[%c0, %c0_0] : memref<192x128xbf16, #tpu.memory_space<vmem>>, vector<192x128xbf16>
    %c0_1 = arith.constant 0 : index
    %c0_2 = arith.constant 0 : index
    %1 = vector.load %arg4[%c0_1, %c0_2] : memref<1x128xf32, #tpu.memory_space<vmem>>, vector<1x128xf32>
    %c0_3 = arith.constant 0 : index
    %c0_4 = arith.constant 0 : index
    %c0_5 = arith.constant 0 : index
    %2 = vector.load %arg2[%c0_3, %c0_4, %c0_5] : memref<2x16x64xbf16, #tpu.memory_space<vmem>>, vector<1x14x64xbf16>
    %3 = vector.shape_cast %2 : vector<1x14x64xbf16> to vector<14x64xbf16>
    %c0_6 = arith.constant 0 : index
    %c1 = arith.constant 1 : index
    %c0_7 = arith.constant 0 : index
    %4 = vector.load %arg2[%c0_6, %c1, %c0_7] : memref<2x16x64xbf16, #tpu.memory_space<vmem>>, vector<1x14x64xbf16>
    %5 = vector.shape_cast %4 : vector<1x14x64xbf16> to vector<14x64xbf16>
    %c0_8 = arith.constant 0 : index
    %c2 = arith.constant 2 : index
    %c0_9 = arith.constant 0 : index
    %6 = vector.load %arg2[%c0_8, %c2, %c0_9] : memref<2x16x64xbf16, #tpu.memory_space<vmem>>, vector<1x14x64xbf16>
    %7 = vector.shape_cast %6 : vector<1x14x64xbf16> to vector<14x64xbf16>
    %8 = tpu.concatenate %3, %5, %7 in 1 : vector<14x64xbf16>, vector<14x64xbf16>, vector<14x64xbf16> -> vector<14x192xbf16>
    %cst = arith.constant dense<0.000000e+00> : vector<14x128xf32>
    %9 = tpu.matmul %8, %0, %cst {dimension_numbers = #tpu.dot_dimension_numbers<[1], [0], [0], [1], [0, 0, 1, 1], [], []>} : vector<14x192xbf16>, vector<192x128xbf16>, vector<14x128xf32> -> vector<14x128xf32>
    %10 = vector.broadcast %1 : vector<1x128xf32> to vector<14x128xf32>
    %11 = arith.addf %9, %10 : vector<14x128xf32>
    %c0_10 = arith.constant 0 : index
    %c0_11 = arith.constant 0 : index
    %c0_12 = arith.constant 0 : index
    %12 = vector.load %arg5[%c0_10, %c0_11, %c0_12] : memref<2x14x128xf32, #tpu.memory_space<vmem>>, vector<1x14x128xf32>
    %13 = vector.shape_cast %12 : vector<1x14x128xf32> to vector<14x128xf32>
    %14 = vector.shape_cast %11 : vector<14x128xf32> to vector<1x14x128xf32>
    tpu.vector_store %arg5[%c0_10, %c0_11, %c0_12], %14 {strides = array<i32>} : memref<2x14x128xf32, #tpu.memory_space<vmem>>, vector<1x14x128xf32>,
    %c1_13 = arith.constant 1 : index
    %c0_14 = arith.constant 0 : index
    %c0_15 = arith.constant 0 : index
    %15 = vector.load %arg2[%c1_13, %c0_14, %c0_15] : memref<2x16x64xbf16, #tpu.memory_space<vmem>>, vector<1x14x64xbf16>
    %16 = vector.shape_cast %15 : vector<1x14x64xbf16> to vector<14x64xbf16>
    %c1_16 = arith.constant 1 : index
    %c1_17 = arith.constant 1 : index
    %c0_18 = arith.constant 0 : index
    %17 = vector.load %arg2[%c1_16, %c1_17, %c0_18] : memref<2x16x64xbf16, #tpu.memory_space<vmem>>, vector<1x14x64xbf16>
    %18 = vector.shape_cast %17 : vector<1x14x64xbf16> to vector<14x64xbf16>
    %c1_19 = arith.constant 1 : index
    %c2_20 = arith.constant 2 : index
    %c0_21 = arith.constant 0 : index
    %19 = vector.load %arg2[%c1_19, %c2_20, %c0_21] : memref<2x16x64xbf16, #tpu.memory_space<vmem>>, vector<1x14x64xbf16>
    %20 = vector.shape_cast %19 : vector<1x14x64xbf16> to vector<14x64xbf16>
    %21 = tpu.concatenate %16, %18, %20 in 1 : vector<14x64xbf16>, vector<14x64xbf16>, vector<14x64xbf16> -> vector<14x192xbf16>
    %cst_22 = arith.constant dense<0.000000e+00> : vector<14x128xf32>
    %22 = tpu.matmul %21, %0, %cst_22 {dimension_numbers = #tpu.dot_dimension_numbers<[1], [0], [0], [1], [0, 0, 1, 1], [], []>} : vector<14x192xbf16>, vector<192x128xbf16>, vector<14x128xf32> -> vector<14x128xf32>
    %23 = vector.broadcast %1 : vector<1x128xf32> to vector<14x128xf32>
    %24 = arith.addf %22, %23 : vector<14x128xf32>
    %c1_23 = arith.constant 1 : index
    %c0_24 = arith.constant 0 : index
    %c0_25 = arith.constant 0 : index
    %25 = vector.load %arg5[%c1_23, %c0_24, %c0_25] : memref<2x14x128xf32, #tpu.memory_space<vmem>>, vector<1x14x128xf32>
    %26 = vector.shape_cast %25 : vector<1x14x128xf32> to vector<14x128xf32>
    %27 = vector.shape_cast %24 : vector<14x128xf32> to vector<1x14x128xf32>
    tpu.vector_store %arg5[%c1_23, %c0_24, %c0_25], %27 {strides = array<i32>} : memref<2x14x128xf32, #tpu.memory_space<vmem>>, vector<1x14x128xf32>,
    return
  }
  func.func @transform_0(%arg0: i32, %arg1: i32) -> (i32, i32, i32) {
    %c0_i32 = arith.constant 0 : i32
    %c0_i32_0 = arith.constant 0 : i32
    %c0_i32_1 = arith.constant 0 : i32
    return %arg1, %c0_i32, %c0_i32_0 : i32, i32, i32
  }
  func.func @transform_1(%arg0: i32, %arg1: i32) -> (i32, i32) {
    %c0_i32 = arith.constant 0 : i32
    %c0_i32_0 = arith.constant 0 : i32
    return %c0_i32, %arg0 : i32, i32
  }
  func.func @transform_2(%arg0: i32, %arg1: i32) -> (i32, i32) {
    %c0_i32 = arith.constant 0 : i32
    %c0_i32_0 = arith.constant 0 : i32
    return %c0_i32, %arg0 : i32, i32
  }
  func.func @transform_3(%arg0: i32, %arg1: i32) -> (i32, i32, i32) {
    %c0_i32 = arith.constant 0 : i32
    %c0_i32_0 = arith.constant 0 : i32
    return %arg1, %c0_i32, %arg0 : i32, i32, i32
  }
}

</mosaic_0001>

<bundles_post_ra>
// kernel: temporal_gc.1
= control target key start
LH: loop header
LB: loop body
LE: loop exit
PB: predicated region body
PF: predicated region fallthrough
CT: control target
= control target key end

     0   :  { %v322_v3 = vmov 0   ;;  %s323_s26 = smov 64   ;;  %vm65_vm0 = vcmask 523264   ;;  %s455_s0 = inlined_call_operand.vmem [shape: bf16[2,16,64], index: 0, kind: input, shape index: {}]   ;;  %s456_s1 = inlined_call_operand.vmem [shape: bf16[192,128], index: 1, kind: input, shape index: {}]   ;;  %s457_s2 = inlined_call_operand.vmem [shape: f32[1,128], index: 2, kind: input, shape index: {}]   ;;  %s458_s3 = inlined_call_operand.vmem [shape: f32[2,14,128], index: 3, kind: output, shape index: {}]  }
   0x1   :  { %v347_v0 = vld [vmem:[%s455_s0] sm:$0xf]  ;;  %v42_v1 = vld [vmem:[%s455_s0 + $0x4] sm:$0xf]  ;;  %v355_v2 = vld [vmem:[%s455_s0 + $0x8] sm:$0xf]  ;;  %151 = vmatprep.subr.bf16.mxu0 %v322_v3  ;;  %227 = vmatprep.subr.bf16.mxu1 %v322_v3 }
   0x2   :  { %v276_v4 = vcombine.low %v347_v0, %v42_v1  ;;  %v294_v5 = vld [vmem:[%s455_s0 + $0xc] sm:$0xf]  ;;  %v306_v7 = vld [vmem:[%s456_s1] sm:$0xff]   ;;  %v308_v16 = vld [vmem:[%s456_s1 + $0x10] sm:$0xff]  }
   0x3   :  { %v297_v6 = vcombine.low %v355_v2, %v294_v5  ;;  %152 = vmatpush1.bf16.msra.mxu0 %v306_v7  ;;  %v307_v11 = vld [vmem:[%s456_s1 + $0x8] sm:$0xff]   ;;  %228 = vmatpush1.bf16.msra.mxu1 %v306_v7  ;;  %v309_v18 = vld [vmem:[%s456_s1 + $0x18] sm:$0xff]   ;;  %v43_v19 = vld [vmem:[%s455_s0] sm:$0xe] }
   0x4   :  { %v53_v8 = vshrl.u32 %v276_v4, 16  ;;  %v55_v9 = vshll.u32 %v276_v4, 16  ;;  %153 = vmatprep.subr.bf16.mxu0 %v322_v3  ;;  %229 = vmatprep.subr.bf16.mxu1 %v322_v3  ;;  %v277_v20 = vcombine.low %v43_v19, %v42_v1  ;;  %v41_v21 = vld [vmem:[%s455_s0 + $0x4] sm:$0x7]  ;;  %v295_v22 = vld [vmem:[%s455_s0 + $0x8] sm:$0xe] }
   0x5   :  { %v210_v10 = vshll.u32 %v297_v6, 16  ;;  %v208_v13 = vshrl.u32 %v297_v6, 16  ;;  %v293_v23 = vld [vmem:[%s455_s0 + $0xc] sm:$0x7]  ;;  %v275_v24 = vcombine.low %v347_v0, %v41_v21  ;;  %v298_v25 = vcombine.low %v295_v22, %v294_v5  ;;  %v310_v27 = vld [vmem:[%s456_s1 + $0x20] sm:$0xff]   ;;  %v312_v31 = vld [vmem:[%s456_s1 + $0x30] sm:$0xff]  }
   0x6   :  { %v57_v12 = vrot.slane %v55_v9, 1  ;;  %v296_v26 = vcombine.low %v355_v2, %v293_v23  ;;  %v64_v28 = vrot.slane %v277_v20, 1  ;;  %v311_v30 = vld [vmem:[%s456_s1 + $0x28] sm:$0xff]   ;;  %v313_v32 = vld [vmem:[%s456_s1 + $0x38] sm:$0xff]   ;;  %v314_v33 = vld [vmem:[%s456_s1 + $0x40] sm:$0xff]  }
   0x7   :  { %v212_v14 = vrot.slane %v210_v10, 1  ;;  %154 = vmatpush1.bf16.msra.mxu0 %v307_v11  ;;  %230 = vmatpush1.bf16.msra.mxu1 %v307_v11  ;;  %v219_v29 = vrot.slane %v298_v25, 1  ;;  %v315_v34 = vld [vmem:[%s456_s1 + $0x48] sm:$0xff]   ;;  %v316_v35 = vld [vmem:[%s456_s1 + $0x50] sm:$0xff]   ;;  %v317_v36 = vld [vmem:[%s456_s1 + $0x58] sm:$0xff]  }
   0x8   :  { %v58_v15 = vor.u32 %v57_v12, %v53_v8  ;;  %155 = vmatprep.subr.bf16.mxu0 %v322_v3  ;;  %231 = vmatprep.subr.bf16.mxu1 %v322_v3  ;;  %v278_v41 = vld [vmem:[%s457_s2] ss:$0 sm:$0xff] }
   0x9   :  { %v213_v17 = vor.u32 %v212_v14, %v208_v13  ;;  %291 = vmatprep.mubr.msk.bf16.mxu0 %vm65_vm0, %v64_v28  ;;  %299 = vmatprep.mubr.msk.bf16.mxu1 %vm65_vm0, %v219_v29 }
   0xa   :  { %59 = vrot.lane.b32.xlu0 %v58_v15, %s323_s26 }
   0xb   :  { %156 = vmatpush1.bf16.msra.mxu0 %v308_v16  ;;  %232 = vmatpush1.bf16.msra.mxu1 %v308_v16 }
   0xc   :  { %157 = vmatprep.subr.bf16.mxu0 %v322_v3  ;;  %233 = vmatprep.subr.bf16.mxu1 %v322_v3 }
   0xe   :  { %214 = vrot.lane.b32.xlu0 %v213_v17, %s323_s26 }
   0xf   :  { %158 = vmatpush1.bf16.msra.mxu0 %v309_v18  ;;  %234 = vmatpush1.bf16.msra.mxu1 %v309_v18 }
  0x10   :  { %159 = vmatprep.subr.bf16.mxu0 %v322_v3  ;;  %235 = vmatprep.subr.bf16.mxu1 %v322_v3 }
  0x13   :  { %160 = vmatpush1.bf16.msra.mxu0 %v310_v27  ;;  %236 = vmatpush1.bf16.msra.mxu1 %v310_v27 }
  0x14   :  { %161 = vmatprep.subr.bf16.mxu0 %v322_v3  ;;  %237 = vmatprep.subr.bf16.mxu1 %v322_v3 }
  0x17   :  { %162 = vmatpush1.bf16.msra.mxu0 %v311_v30  ;;  %238 = vmatpush1.bf16.msra.mxu1 %v311_v30 }
  0x18   :  { %163 = vmatprep.subr.bf16.mxu0 %v322_v3  ;;  %239 = vmatprep.subr.bf16.mxu1 %v322_v3 }
  0x1b   :  { %164 = vmatpush1.bf16.msra.mxu0 %v312_v31  ;;  %240 = vmatpush1.bf16.msra.mxu1 %v312_v31 }
  0x1c   :  { %165 = vmatprep.subr.bf16.mxu0 %v322_v3  ;;  %241 = vmatprep.subr.bf16.mxu1 %v322_v3 }
  0x1f   :  { %166 = vmatpush1.bf16.msra.mxu0 %v313_v32  ;;  %242 = vmatpush1.bf16.msra.mxu1 %v313_v32 }
  0x20   :  { %167 = vmatprep.subr.bf16.mxu0 %v322_v3  ;;  %243 = vmatprep.subr.bf16.mxu1 %v322_v3 }
  0x23   :  { %168 = vmatpush1.bf16.msra.mxu0 %v314_v33  ;;  %244 = vmatpush1.bf16.msra.mxu1 %v314_v33 }
  0x24   :  { %169 = vmatprep.subr.bf16.mxu0 %v322_v3  ;;  %245 = vmatprep.subr.bf16.mxu1 %v322_v3 }
  0x27   :  { %170 = vmatpush1.bf16.msra.mxu0 %v315_v34  ;;  %246 = vmatpush1.bf16.msra.mxu1 %v315_v34 }
  0x28   :  { %171 = vmatprep.subr.bf16.mxu0 %v322_v3  ;;  %247 = vmatprep.subr.bf16.mxu1 %v322_v3 }
  0x2b   :  { %172 = vmatpush1.bf16.msra.mxu0 %v316_v35  ;;  %248 = vmatpush1.bf16.msra.mxu1 %v316_v35 }
  0x2c   :  { %173 = vmatprep.subr.bf16.mxu0 %v322_v3  ;;  %249 = vmatprep.subr.bf16.mxu1 %v322_v3 }
  0x2f   :  { %174 = vmatpush1.bf16.msra.mxu0 %v317_v36  ;;  %250 = vmatpush1.bf16.msra.mxu1 %v317_v36 }
  0x7c   :  { %v60_v37 = vpop.permute.xlu0 %59 }
  0x7d   :  { %v68_v38 = vsel %vm65_vm0, %v275_v24, %v60_v37 }
  0x7e   :  { %184 = vmatmul.mubr.bf16.vlgmr.msra.gmra.mrb[0].mxu0 %v68_v38 }
  0x80   :  { %v215_v39 = vpop.permute.xlu0 %214 }
  0x81   :  { %v222_v40 = vsel %vm65_vm0, %v296_v26, %v215_v39 }
  0x82   :  { %260 = vmatmul.mubr.bf16.vlgmr.msra.gmra.mrb[0].mxu1 %v222_v40 }
 0x151   :  { %v185_v42 = vpop.f32.mrb[0].mxu0 }
 0x152   :  { %v186_v43 = vadd.f32 %v278_v41, %v185_v42  ;;  %v187_v44 = vpop.f32.mrb[1].mxu0 }
 0x153   :  { %v188_v45 = vpop.f32.mrb[2].mxu0 }
 0x154   :  { %192 = vst [vmem:[%s458_s3] sm:$0xff] %v186_v43  ;;  %v189_v46 = vadd.f32 %v278_v41, %v188_v45  ;;  %v190_v47 = vpop.f32.mrb[3].mxu0 }
 0x155   :  { %v261_v48 = vpop.f32.mrb[0].mxu1 }
 0x156   :  { %193 = vst [vmem:[%s458_s3 + $0x8] sm:$0x3f] %v189_v46  ;;  %v262_v49 = vadd.f32 %v278_v41, %v261_v48  ;;  %v263_v50 = vpop.f32.mrb[1].mxu1 }
 0x157   :  { %v264_v51 = vpop.f32.mrb[2].mxu1 }
 0x158   :  { %300 = vst [vmem:[%s458_s3 + $0x10] sm:$0xff] %v262_v49  ;;  %v265_v52 = vadd.f32 %v278_v41, %v264_v51  ;;  %v266_v53 = vpop.f32.mrb[3].mxu1 }
 0x15a   :  { %301 = vst [vmem:[%s458_s3 + $0x18] sm:$0x3f] %v265_v52 }

</bundles_post_ra>
